<compile_context>
chip_gen: v5e
topology: v5e:2x2
jax: 0.10.0
libtpu: 0.0.40
codegen_flags: <defaults>
</compile_context>

<pallas_src>
import jax
import jax.numpy as jnp
from jax.experimental import pallas as pl
from jax.experimental.pallas import tpu as pltpu


def _round_up(v, m):
    return ((v + m - 1) // m) * m


def _pick_tk(d_in, tk_default):
    """Choose the K tile and padded K extent.

    Correctness rule: partial tiles along the contraction dim are NOT allowed
    (garbage would sum into valid outputs), so either the block covers the
    full K extent, or K is zero-padded to a multiple of the tile.
    """
    if d_in <= tk_default:
        return d_in, d_in            # single full-K block, no padding
    kp = _round_up(d_in, 128)
    tk = 128
    for cand in range(tk_default, 127, -128):   # largest 128-multiple divisor
        if kp % cand == 0:
            tk = cand
            break
    return tk, kp


def _linear_kernel(x_ref, w_ref, b_ref, o_ref):
    # x_ref: (tm, tk), w_ref: (tn, tk) [native torch (D_out, D_in) layout],
    # b_ref: (1, tn),  o_ref: (tm, tn) f32 -- VMEM-resident accumulator across K.
    k = pl.program_id(2)

    @pl.when(k == 0)
    def _init():
        # Seed the accumulator with the bias: added exactly once per output
        # tile and removes the need for a separate finalize pass.
        o_ref[...] = jnp.broadcast_to(b_ref[...].astype(jnp.float32), o_ref.shape)

    # y_tile += x_tile @ w_tile^T on the MXU (transposed-RHS contraction,
    # weight consumed untransposed; f32 accumulation).
    o_ref[...] += jax.lax.dot_general(
        x_ref[...],
        w_ref[...],
        dimension_numbers=(((1,), (1,)), ((), ())),
        preferred_element_type=jnp.float32,
    )


def prepare_params(weight, bias, use_bf16=True):
    """One-time (model-init) param preparation.

    Casting W to bf16 here instead of inside the forward wrapper removes a
    full weight-sized HBM read+write from every forward call.  Bias stays f32
    (it is tiny and is consumed in f32 inside the kernel).
    """
    w_dtype = jnp.bfloat16 if use_bf16 else weight.dtype
    return weight.astype(w_dtype), bias.astype(jnp.float32)


def linear_forward(x, weight, bias, *, tm=512, tn=512, tk=1024):
    """Pallas equivalent of torch.nn.Linear: y = x @ weight.T + bias.

    x:      (B, D_in)
    weight: (D_out, D_in)  (PyTorch layout; pass through prepare_params first
                            to get the cached bf16 fast path)
    bias:   (D_out,)
    returns (B, D_out) float32
    """
    B, D_in = x.shape
    D_out, _ = weight.shape
    out_dtype = jnp.float32

    in_dtype = weight.dtype                     # bf16 fast path or f32 exact path
    if x.dtype != in_dtype:
        x = x.astype(in_dtype)

    # Tile sizes: clamp to the (aligned) problem size.  tm multiple of 8,
    # tn multiple of 128; tk either the full K extent or a 128-multiple
    # divisor of the padded K extent.
    tm = min(tm, _round_up(B, 8))
    tn = min(tn, _round_up(D_out, 128))
    tk, Kp = _pick_tk(D_in, tk)

    # Only K is zero-padded (required for correct accumulation).  M/N boundary
    # tiles are handled by Pallas with masked partial stores -- no wrapper-side
    # HBM pad pass for x / W along those dims.
    xp, wp = x, weight
    if Kp != D_in:
        xp = jnp.pad(x, ((0, 0), (0, Kp - D_in)))
        wp = jnp.pad(weight, ((0, 0), (0, Kp - D_in)))
    bp = bias.reshape(1, D_out)

    grid_m = pl.cdiv(B, tm)
    grid_n = pl.cdiv(D_out, tn)
    grid_k = Kp // tk
    grid = (grid_m, grid_n, grid_k)
    # NOTE(v7x megacore): for production shapes make sure grid_m*grid_n >= 2,
    # otherwise one TensorCore idles; split N finer for tiny-batch serving.

    in_itemsize = jnp.dtype(in_dtype).itemsize
    footprint = (
        2 * (tm * tk + tn * tk + tn) * in_itemsize   # x, W, bias (double-buffered)
        + 2 * tm * tn * 4                            # f32 output tile (resident)
    )
    try:
        vmem_cap = pltpu.get_tpu_info().vmem_capacity_bytes   # 64 MiB on v7x
    except Exception:
        vmem_cap = 64 * 1024 * 1024                           # v7x worst case
    vmem_limit = int(2 * footprint + (4 << 20))
    vmem_limit = max(vmem_limit, 16 << 20)
    vmem_limit = min(vmem_limit, int(0.75 * vmem_cap))

    cost = pl.CostEstimate(
        flops=2 * B * D_out * Kp,
        transcendentals=0,
        bytes_accessed=(B * Kp * in_itemsize * grid_n
                        + D_out * Kp * in_itemsize * grid_m
                        + D_out * 4
                        + B * D_out * 4),
    )

    return pl.pallas_call(
        _linear_kernel,
        out_shape=jax.ShapeDtypeStruct((B, D_out), out_dtype),
        grid=grid,
        in_specs=[
            pl.BlockSpec((tm, tk), lambda i, j, k: (i, k)),   # x
            pl.BlockSpec((tn, tk), lambda i, j, k: (j, k)),   # weight (D_out, D_in)
            pl.BlockSpec((1, tn), lambda i, j, k: (0, j)),    # bias
        ],
        out_specs=pl.BlockSpec((tm, tn), lambda i, j, k: (i, j)),
        compiler_params=pltpu.CompilerParams(
            dimension_semantics=("parallel", "parallel", "arbitrary"),
            vmem_limit_bytes=vmem_limit,
        ),
        cost_estimate=cost,
    )(xp, wp, bp)


if __name__ == "__main__":
    # Small shapes consistent with the module: batch=8, input_dim=32, output_dim=16
    batch, input_dim, output_dim = 8, 32, 16

    key = jax.random.PRNGKey(0)
    kx, kw, kb = jax.random.split(key, 3)

    # Deterministic parameter init mimicking torch.nn.Linear default:
    # U(-1/sqrt(in), 1/sqrt(in)) for both weight and bias.
    bound = 1.0 / (input_dim ** 0.5)
    weight = jax.random.uniform(
        kw, (output_dim, input_dim), jnp.float32, minval=-bound, maxval=bound
    )
    bias = jax.random.uniform(
        kb, (output_dim,), jnp.float32, minval=-bound, maxval=bound
    )
    x = jax.random.normal(kx, (batch, input_dim), jnp.float32)

    y_ref = x @ weight.T + bias

    # Exact f32 path.
    w32, b32 = prepare_params(weight, bias, use_bf16=False)
    y32 = jax.block_until_ready(linear_forward(x, w32, b32))
    assert y32.shape == (batch, output_dim)
    assert jnp.allclose(y32, y_ref, atol=1e-5, rtol=1e-5)

    # Default bf16 fast path (f32 accumulation) -- relaxed tolerance is
    # expected bf16-matmul rounding, not a bug.
    wbf, bbf = prepare_params(weight, bias, use_bf16=True)
    ybf = jax.block_until_ready(linear_forward(x, wbf, bbf))
    assert ybf.shape == (batch, output_dim)
    assert jnp.allclose(ybf, y_ref, atol=3e-2, rtol=3e-2)

    print("KERNEL_OK")
</pallas_src>

<mosaic_0001>
module attributes {stable_mosaic.version = 11 : i64} {
  func.func @_linear_kernel(%arg0: i32, %arg1: i32, %arg2: i32, %arg3: memref<8x32xf32, #tpu.memory_space<vmem>>, %arg4: memref<128x32xf32, #tpu.memory_space<vmem>>, %arg5: memref<1x128xf32, #tpu.memory_space<vmem>>, %arg6: memref<8x128xf32, #tpu.memory_space<vmem>>) attributes {dimension_semantics = [#tpu.dimension_semantics<parallel>, #tpu.dimension_semantics<parallel>, #tpu.dimension_semantics<arbitrary>], iteration_bounds = array<i64: 1, 1, 1>, scalar_prefetch = 0 : i64, scratch_operands = 0 : i64, tpu.core_type = #tpu.core_type<tc>, window_params = [{transform_indices = @transform_0, window_bounds = array<i64: 8, 32>}, {transform_indices = @transform_1, window_bounds = array<i64: 128, 32>}, {transform_indices = @transform_2, window_bounds = array<i64: 1, 128>}, {transform_indices = @transform_3, window_bounds = array<i64: 8, 128>}]} {
    %c0_i32 = arith.constant 0 : i32
    %0 = arith.cmpi eq, %arg2, %c0_i32 : i32
    %1 = arith.extui %0 : i1 to i32
    %c0_i32_0 = arith.constant 0 : i32
    %2 = arith.cmpi ne, %1, %c0_i32_0 : i32
    scf.if %2 {
      %c0_8 = arith.constant 0 : index
      %c0_9 = arith.constant 0 : index
      %9 = vector.load %arg5[%c0_8, %c0_9] : memref<1x128xf32, #tpu.memory_space<vmem>>, vector<1x128xf32>
      %10 = vector.shape_cast %9 : vector<1x128xf32> to vector<1x128xf32>
      %11 = vector.broadcast %10 : vector<1x128xf32> to vector<8x128xf32>
      %c0_10 = arith.constant 0 : index
      %c0_11 = arith.constant 0 : index
      %12 = vector.load %arg6[%c0_10, %c0_11] : memref<8x128xf32, #tpu.memory_space<vmem>>, vector<8x128xf32>
      tpu.vector_store %arg6[%c0_10, %c0_11], %11 {strides = array<i32>} : memref<8x128xf32, #tpu.memory_space<vmem>>, vector<8x128xf32>,
    } else {
    }
    %c0 = arith.constant 0 : index
    %c0_1 = arith.constant 0 : index
    %3 = vector.load %arg6[%c0, %c0_1] : memref<8x128xf32, #tpu.memory_space<vmem>>, vector<8x128xf32>
    %c0_2 = arith.constant 0 : index
    %c0_3 = arith.constant 0 : index
    %4 = vector.load %arg3[%c0_2, %c0_3] : memref<8x32xf32, #tpu.memory_space<vmem>>, vector<8x32xf32>
    %c0_4 = arith.constant 0 : index
    %c0_5 = arith.constant 0 : index
    %5 = vector.load %arg4[%c0_4, %c0_5] : memref<128x32xf32, #tpu.memory_space<vmem>>, vector<128x32xf32>
    %cst = arith.constant dense<0.000000e+00> : vector<8x128xf32>
    %6 = tpu.matmul %4, %5, %cst {dimension_numbers = #tpu.dot_dimension_numbers<[1], [1], [0], [0], [0, 0, 1, 0], [], []>} : vector<8x32xf32>, vector<128x32xf32>, vector<8x128xf32> -> vector<8x128xf32>
    %7 = arith.addf %3, %6 : vector<8x128xf32>
    %c0_6 = arith.constant 0 : index
    %c0_7 = arith.constant 0 : index
    %8 = vector.load %arg6[%c0_6, %c0_7] : memref<8x128xf32, #tpu.memory_space<vmem>>, vector<8x128xf32>
    tpu.vector_store %arg6[%c0_6, %c0_7], %7 {strides = array<i32>} : memref<8x128xf32, #tpu.memory_space<vmem>>, vector<8x128xf32>,
    return
  }
  func.func @transform_0(%arg0: i32, %arg1: i32, %arg2: i32) -> (i32, i32) {
    %c0_i32 = arith.constant 0 : i32
    return %arg0, %arg2 : i32, i32
  }
  func.func @transform_1(%arg0: i32, %arg1: i32, %arg2: i32) -> (i32, i32) {
    %c0_i32 = arith.constant 0 : i32
    return %arg1, %arg2 : i32, i32
  }
  func.func @transform_2(%arg0: i32, %arg1: i32, %arg2: i32) -> (i32, i32) {
    %c0_i32 = arith.constant 0 : i32
    %c0_i32_0 = arith.constant 0 : i32
    return %c0_i32, %arg1 : i32, i32
  }
  func.func @transform_3(%arg0: i32, %arg1: i32, %arg2: i32) -> (i32, i32) {
    %c0_i32 = arith.constant 0 : i32
    return %arg0, %arg1 : i32, i32
  }
}

</mosaic_0001>

<bundles_post_ra>
// kernel: tpu_custom_call.1
= control target key start
LH: loop header
LB: loop body
LE: loop exit
PB: predicated region body
PF: predicated region fallthrough
CT: control target
= control target key end

     0   :  { %8 = vsyncpa [#allocation3], 0  ;;  %s319_s0 = inlined_call_operand.hbm [shape: f32[8,32], index: 0, kind: input, shape index: {}]   ;;  %s320_s1 = inlined_call_operand.hbm [shape: f32[16,32], index: 1, kind: input, shape index: {}]   ;;  %s321_s2 = inlined_call_operand.vmem [shape: f32[1,16], index: 2, kind: input, shape index: {}]   ;;  %s322_s3 = inlined_call_operand.hbm [shape: f32[8,16], index: 3, kind: output, shape index: {}]  }
   0x1   :  { %9 = vsyncpa [#allocation6], 0 }
   0x2   :  { %10 = vsyncpa [#allocation4], 0  ;;  %s16_s14 = sshll.u32 %s319_s0, 4  ;;  %s265_s15 = smov [#allocation2]   ;;  %s17_s14 = int_to_ptr.hbm [resolvable:$true] %s16_s14 }
   0x3   :  { %s18_s16 = sshll.u32 %s265_s15, 4  ;;  %s19_s16 = int_to_ptr.vmem [resolvable:$true] %s18_s16 }
   0x4   :  { %21 = dma.hbm_to_vmem [thread:$0]  %s17_s14, 128, %s19_s16, [#allocation3]  }
   0x5   :  { %25 = vsyncadd [#allocation6], 1792  ;;  %s26_s19 = sshll.u32 %s320_s1, 4  ;;  %s266_s20 = smov [#allocation5]   ;;  %s27_s19 = int_to_ptr.hbm [resolvable:$true] %s26_s19 }
   0x6   :  { %s28_s21 = sshll.u32 %s266_s20, 4  ;;  %s267_s22 = smov 128   ;;  %s29_s21 = int_to_ptr.vmem [resolvable:$true] %s28_s21 }
   0x7   :  { %s268_s23 = smov 8  }
   0x8   :  { %34 = dma.hbm_to_vmem [thread:$0]  %s27_s19, 256, %s29_s21, [#allocation6], %s267_s22, %s267_s22, %s268_s23  }
   0x9   :  { %259 = dma.done.wait [#allocation3], 128  }
   0xa   :  { %260 = vsyncadd [#allocation3], 4294967168 }
   0xb   :  { %261 = dma.done.wait [#allocation6], 2048  }
   0xc   :  { %262 = vsyncadd [#allocation6], 4294965248  ;;  %vm72_vm0 = vcmask 261120   ;;  %v71_v0 = vld [vmem:[#allocation5 + $0x78] sm:$0xff]  ;;  %v70_v1 = vld [vmem:[#allocation5 + $0x70] sm:$0xff]  ;;  %s269_s24 = smov [#allocation7]  }
   0xd   :  { %164 = vmatpush.xpose.msk.msra.mxu0 %vm72_vm0, %v71_v0  ;;  %v69_v2 = vld [vmem:[#allocation5 + $0x68] sm:$0xff]  ;;  %v68_v3 = vld [vmem:[#allocation5 + $0x60] sm:$0xff]  ;;  %v67_v4 = vld [vmem:[#allocation5 + $0x58] sm:$0xff]  ;;  %s151_s25 = sshll.u32 %s269_s24, 4  ;;  %s153_s28 = sshll.u32 %s322_s3, 4  ;;  %s152_s25 = int_to_ptr.vmem [resolvable:$true] %s151_s25  ;;  %s154_s28 = int_to_ptr.hbm [resolvable:$true] %s153_s28 }
   0xe   :  { %v66_v5 = vld [vmem:[#allocation5 + $0x50] sm:$0xff]  ;;  %v65_v6 = vld [vmem:[#allocation5 + $0x48] sm:$0xff]  ;;  %v64_v7 = vld [vmem:[#allocation5 + $0x40] sm:$0xff] }
   0xf   :  { %v63_v8 = vld [vmem:[#allocation5 + $0x38] sm:$0xff]  ;;  %v62_v9 = vld [vmem:[#allocation5 + $0x30] sm:$0xff]  ;;  %v61_v10 = vld [vmem:[#allocation5 + $0x28] sm:$0xff] }
  0x10   :  { %v60_v11 = vld [vmem:[#allocation5 + $0x20] sm:$0xff]  ;;  %v59_v12 = vld [vmem:[#allocation5 + $0x18] sm:$0xff]  ;;  %v58_v13 = vld [vmem:[#allocation5 + $0x10] sm:$0xff] }
  0x11   :  { %165 = vmatpush.xpose.msk.msra.mxu0 %vm72_vm0, %v70_v1  ;;  %v57_v14 = vld [vmem:[#allocation5 + $0x8] sm:$0xff]  ;;  %v56_v15 = vld [vmem:[#allocation5] sm:$0xff]  ;;  %v55_v16 = vld [vmem:[#allocation2] sm:$0xff] }
  0x12   :  { %v186_v17 = vld [vmem:[%s321_s2] ss:$0 sm:$0xff] }
  0x15   :  { %166 = vmatpush.xpose.msk.msra.mxu0 %vm72_vm0, %v69_v2 }
  0x19   :  { %167 = vmatpush.xpose.msk.msra.mxu0 %vm72_vm0, %v68_v3 }
  0x1d   :  { %168 = vmatpush.xpose.msk.msra.mxu0 %vm72_vm0, %v67_v4 }
  0x21   :  { %169 = vmatpush.xpose.msk.msra.mxu0 %vm72_vm0, %v66_v5 }
  0x25   :  { %170 = vmatpush.xpose.msk.msra.mxu0 %vm72_vm0, %v65_v6 }
  0x29   :  { %171 = vmatpush.xpose.msk.msra.mxu0 %vm72_vm0, %v64_v7 }
  0x2d   :  { %172 = vmatpush.xpose.msk.msra.mxu0 %vm72_vm0, %v63_v8 }
  0x31   :  { %173 = vmatpush.xpose.msk.msra.mxu0 %vm72_vm0, %v62_v9 }
  0x35   :  { %174 = vmatpush.xpose.msk.msra.mxu0 %vm72_vm0, %v61_v10 }
  0x39   :  { %175 = vmatpush.xpose.msk.msra.mxu0 %vm72_vm0, %v60_v11 }
  0x3d   :  { %176 = vmatpush.xpose.msk.msra.mxu0 %vm72_vm0, %v59_v12 }
  0x41   :  { %177 = vmatpush.xpose.msk.msra.mxu0 %vm72_vm0, %v58_v13 }
  0x45   :  { %178 = vmatpush.xpose.msk.msra.mxu0 %vm72_vm0, %v57_v14 }
  0x49   :  { %179 = vmatpush.xpose.msk.msra.mxu0 %vm72_vm0, %v56_v15 }
  0x4c   :  { %180 = vmatmul.msk.f32.vlgmr.msra.gmra.mxu0 %vm72_vm0, %v55_v16 }
  0xc9   :  { %v141_v18 = vpop.f32.mrf.mxu0 }
  0xca   :  { %v144_v19 = vadd.f32 %v186_v17, %v141_v18 }
  0xcc   :  { %145 = vst [vmem:[#allocation7] sm:$0xff] %v144_v19 }
  0xcd   :  { %156 = dma.vmem_to_hbm [thread:$0]  %s152_s25, 128, %s154_s28, [#allocation4]  }
  0xce   :  { %263 = dma.done.wait [#allocation4], 128  }
  0xcf   :  { %264 = vsyncadd [#allocation4], 4294967168 }
  0xd0   :  { %161 = vsyncpa [#allocation3], 1 }
  0xd1   :  { %162 = vsyncpa [#allocation6], 1 }
  0xd2   :  { %163 = vsyncpa [#allocation4], 1 }

</bundles_post_ra>
